<compile_context>
chip_gen: v5e
topology: v5e:2x2
jax: 0.10.0
libtpu: 0.0.40
codegen_flags: <defaults>
</compile_context>

<pallas_src>
import jax
import jax.numpy as jnp
from jax.experimental import pallas as pl
from jax.experimental.pallas import tpu as pltpu

INPUT_LEN = 5
HIDDEN1 = 50
HIDDEN2 = 30
N_ACTIONS = 4  # env.action_space.n — synthetic choice (env not available)

# Layout-friendly padded sizes (hidden dims only; input/output stay narrow).
H1_PAD = 128
H2_PAD = 128
OUT_PAD = N_ACTIONS  # full-last-dim output block -> no wrapper lane slice

MAX_TB = 2048        # max rows per batch tile (VMEM is nowhere near a limit)
SPLIT_THRESHOLD = 512  # above this, force >=2 grid steps (v7x dual-TC)


def _round_up(n, m):
    return ((n + m - 1) // m) * m


def _net_kernel(x_ref, w1_ref, b1_ref, w2_ref, b2_ref, w3_ref, b3_ref, o_ref):
    # Normalization is folded into (w1, b1); body = 3 bf16 MXU matmuls with
    # f32 accumulation, bias + ReLU in f32.  Intermediates never leave VMEM.
    x = x_ref[...].astype(jnp.bfloat16)

    h1 = jnp.dot(x, w1_ref[...],
                 preferred_element_type=jnp.float32) + b1_ref[...]
    h1 = jnp.maximum(h1, 0.0)

    h2 = jnp.dot(h1.astype(jnp.bfloat16), w2_ref[...],
                 preferred_element_type=jnp.float32) + b2_ref[...]
    h2 = jnp.maximum(h2, 0.0)

    out = jnp.dot(h2.astype(jnp.bfloat16), w3_ref[...],
                  preferred_element_type=jnp.float32) + b3_ref[...]
    o_ref[...] = out.astype(o_ref.dtype)


@jax.jit
def net_forward(x, params):
    """x: (B, 5) or (5,) float32. params: prepared (folded/padded/bf16) params.
    Returns (B, N_ACTIONS) or (N_ACTIONS,)."""
    squeeze = (x.ndim == 1)
    if squeeze:
        x = x[None, :]
    B = x.shape[0]
    x = x.astype(jnp.float32)

    # Static tiling decisions (depend only on traced shapes).
    b_eff = _round_up(B, 8)
    if b_eff >= SPLIT_THRESHOLD:
        # >= 2 grid steps so ("parallel",) uses both v7x TensorCores.
        tb = min(MAX_TB, _round_up(-(-b_eff // 2), 8))
    else:
        tb = min(MAX_TB, b_eff)
    b_pad = _round_up(B, tb)

    # Pad batch rows only if needed (zero rows are inert; sliced off below).
    if b_pad != B:
        x = jnp.pad(x, ((0, b_pad - B), (0, 0)))

    w1, b1, w2, b2, w3, b3 = params

    out = pl.pallas_call(
        _net_kernel,
        out_shape=jax.ShapeDtypeStruct((b_pad, OUT_PAD), jnp.float32),
        grid=(b_pad // tb,),
        in_specs=[
            pl.BlockSpec((tb, INPUT_LEN), lambda i: (i, 0)),       # x tile (last dim = full)
            pl.BlockSpec((INPUT_LEN, H1_PAD), lambda i: (0, 0)),   # w1 (resident)
            pl.BlockSpec((1, H1_PAD), lambda i: (0, 0)),           # b1
            pl.BlockSpec((H1_PAD, H2_PAD), lambda i: (0, 0)),      # w2
            pl.BlockSpec((1, H2_PAD), lambda i: (0, 0)),           # b2
            pl.BlockSpec((H2_PAD, OUT_PAD), lambda i: (0, 0)),     # w3 (narrow)
            pl.BlockSpec((1, OUT_PAD), lambda i: (0, 0)),          # b3
        ],
        out_specs=pl.BlockSpec((tb, OUT_PAD), lambda i: (i, 0)),   # lane-narrow logits
        compiler_params=pltpu.CompilerParams(
            dimension_semantics=("parallel",)),
    )(x, w1, b1, w2, b2, w3, b3)

    if b_pad != B:
        out = out[:B]
    if squeeze:
        out = out[0]
    return out


def init_params(key):
    """Raw parameters matching the PyTorch module:
       weight.normal_(0, 0.1); bias ~ U(-1/sqrt(fan_in), 1/sqrt(fan_in)).
       Stored pre-transposed as (in, out), float32."""
    ks = jax.random.split(key, 6)

    def linear(kw, kb, fan_in, fan_out):
        w = (0.1 * jax.random.normal(kw, (fan_out, fan_in), jnp.float32)).T
        bound = 1.0 / jnp.sqrt(jnp.float32(fan_in))
        b = jax.random.uniform(kb, (1, fan_out), jnp.float32, -bound, bound)
        return w, b

    w1, b1 = linear(ks[0], ks[1], INPUT_LEN, HIDDEN1)
    w2, b2 = linear(ks[2], ks[3], HIDDEN1, HIDDEN2)
    w3, b3 = linear(ks[4], ks[5], HIDDEN2, N_ACTIONS)
    return (w1, b1, w2, b2, w3, b3)


def prepare_params(raw_params):
    """One-time transform: fold input normalization into fc1, zero-pad the
    hidden dims to 128 lanes, store weight matrices in bf16 (biases f32)."""
    w1, b1, w2, b2, w3, b3 = raw_params

    offset = jnp.array([1.0, 1.0, 1.0, 0.0, 0.0], jnp.float32)
    scale = jnp.array([1.0 / 24.0, 1.0 / 3.0, 1.0 / 30.0,
                       1.0 / 240.0, 1.0 / 240.0], jnp.float32)

    # ((x + off) * scl) @ w1 + b1  ==  x @ (scl[:,None]*w1) + ((off*scl)@w1 + b1)
    w1f = scale[:, None] * w1                               # (5, 50)
    b1f = (offset * scale) @ w1 + b1.reshape(-1)            # (50,)

    def pad_mat(w, rows, cols):
        w = jnp.pad(w, ((0, rows - w.shape[0]), (0, cols - w.shape[1])))
        return w.astype(jnp.bfloat16)

    def pad_bias(b, cols):
        b = b.reshape(1, -1)
        return jnp.pad(b, ((0, 0), (0, cols - b.shape[1]))).astype(jnp.float32)

    return (pad_mat(w1f, INPUT_LEN, H1_PAD), pad_bias(b1f, H1_PAD),
            pad_mat(w2, H1_PAD, H2_PAD), pad_bias(b2, H2_PAD),
            pad_mat(w3, H2_PAD, OUT_PAD), pad_bias(b3, OUT_PAD))


def reference_forward(x, raw_params):
    """Pure-JAX f32 reference using the RAW (unfolded, unpadded) params."""
    squeeze = (x.ndim == 1)
    if squeeze:
        x = x[None, :]
    offset = jnp.array([1.0, 1.0, 1.0, 0.0, 0.0], jnp.float32)
    scale = jnp.array([1 / 24.0, 1 / 3.0, 1 / 30.0, 1 / 240.0, 1 / 240.0],
                      jnp.float32)
    x = (x + offset) * scale
    w1, b1, w2, b2, w3, b3 = raw_params
    h1 = jnp.maximum(x @ w1 + b1, 0.0)
    h2 = jnp.maximum(h1 @ w2 + b2, 0.0)
    out = h2 @ w3 + b3
    return out[0] if squeeze else out


if __name__ == "__main__":
    key = jax.random.PRNGKey(0)
    k_param, k_x = jax.random.split(key)
    raw_params = init_params(k_param)
    params = prepare_params(raw_params)

    # bf16 matmul operands with f32 accumulation -> loosened tolerance.
    ATOL = 5e-2
    RTOL = 5e-2

    # Small batch of synthetic state vectors (B, 5); B a tile multiple ->
    # exactly one custom call, no pad/slice HLOs.
    B = 8
    x = jax.random.uniform(k_x, (B, INPUT_LEN), jnp.float32, 0.0, 24.0)
    out = net_forward(x, params)
    jax.block_until_ready(out)
    ref = reference_forward(x, raw_params)
    assert out.shape == (B, N_ACTIONS)
    assert jnp.allclose(out, ref, atol=ATOL, rtol=RTOL)

    # 1-D input path (single state, like action selection in the DQN loop).
    out1 = net_forward(x[0], params)
    jax.block_until_ready(out1)
    assert out1.shape == (N_ACTIONS,)
    assert jnp.allclose(out1, ref[0], atol=ATOL, rtol=RTOL)

    # A batch size that does not divide the tile -> exercises row-padding.
    k_x2, k_x3 = jax.random.split(k_x)
    x2 = jax.random.uniform(k_x2, (37, INPUT_LEN), jnp.float32, 0.0, 24.0)
    out2 = net_forward(x2, params)
    jax.block_until_ready(out2)
    ref2 = reference_forward(x2, raw_params)
    assert out2.shape == (37, N_ACTIONS)
    assert jnp.allclose(out2, ref2, atol=ATOL, rtol=RTOL)

    # A batch above the split threshold -> grid of 2 "parallel" steps.
    x3 = jax.random.uniform(k_x3, (520, INPUT_LEN), jnp.float32, 0.0, 24.0)
    out3 = net_forward(x3, params)
    jax.block_until_ready(out3)
    ref3 = reference_forward(x3, raw_params)
    assert out3.shape == (520, N_ACTIONS)
    assert jnp.allclose(out3, ref3, atol=ATOL, rtol=RTOL)

    print("KERNEL_OK")
</pallas_src>

<mosaic_0001>
module attributes {stable_mosaic.version = 11 : i64} {
  func.func @_net_kernel(%arg0: i32, %arg1: memref<8x5xf32, #tpu.memory_space<vmem>>, %arg2: memref<5x128xbf16, #tpu.memory_space<vmem>>, %arg3: memref<1x128xf32, #tpu.memory_space<vmem>>, %arg4: memref<128x128xbf16, #tpu.memory_space<vmem>>, %arg5: memref<1x128xf32, #tpu.memory_space<vmem>>, %arg6: memref<128x4xbf16, #tpu.memory_space<vmem>>, %arg7: memref<1x4xf32, #tpu.memory_space<vmem>>, %arg8: memref<8x4xf32, #tpu.memory_space<vmem>>) attributes {dimension_semantics = [#tpu.dimension_semantics<parallel>], iteration_bounds = array<i64: 1>, scalar_prefetch = 0 : i64, scratch_operands = 0 : i64, tpu.core_type = #tpu.core_type<tc>, window_params = [{transform_indices = @transform_0, window_bounds = array<i64: 8, 5>}, {pipeline_mode = #tpu.pipeline_mode<synchronous>, transform_indices = @transform_1, window_bounds = array<i64: 5, 128>}, {pipeline_mode = #tpu.pipeline_mode<synchronous>, transform_indices = @transform_2, window_bounds = array<i64: 1, 128>}, {pipeline_mode = #tpu.pipeline_mode<synchronous>, transform_indices = @transform_3, window_bounds = array<i64: 128, 128>}, {pipeline_mode = #tpu.pipeline_mode<synchronous>, transform_indices = @transform_4, window_bounds = array<i64: 1, 128>}, {pipeline_mode = #tpu.pipeline_mode<synchronous>, transform_indices = @transform_5, window_bounds = array<i64: 128, 4>}, {pipeline_mode = #tpu.pipeline_mode<synchronous>, transform_indices = @transform_6, window_bounds = array<i64: 1, 4>}, {transform_indices = @transform_7, window_bounds = array<i64: 8, 4>}]} {
    %c0 = arith.constant 0 : index
    %c0_0 = arith.constant 0 : index
    %0 = vector.load %arg1[%c0, %c0_0] : memref<8x5xf32, #tpu.memory_space<vmem>>, vector<8x5xf32>
    %1 = arith.truncf %0 : vector<8x5xf32> to vector<8x5xbf16>
    %c0_1 = arith.constant 0 : index
    %c0_2 = arith.constant 0 : index
    %2 = vector.load %arg2[%c0_1, %c0_2] : memref<5x128xbf16, #tpu.memory_space<vmem>>, vector<5x128xbf16>
    %cst = arith.constant dense<0.000000e+00> : vector<8x128xf32>
    %3 = tpu.matmul %1, %2, %cst {dimension_numbers = #tpu.dot_dimension_numbers<[1], [0], [0], [1], [0, 0, 1, 1], [], []>} : vector<8x5xbf16>, vector<5x128xbf16>, vector<8x128xf32> -> vector<8x128xf32>
    %c0_3 = arith.constant 0 : index
    %c0_4 = arith.constant 0 : index
    %4 = vector.load %arg3[%c0_3, %c0_4] : memref<1x128xf32, #tpu.memory_space<vmem>>, vector<1x128xf32>
    %5 = vector.broadcast %4 : vector<1x128xf32> to vector<8x128xf32>
    %6 = arith.addf %3, %5 : vector<8x128xf32>
    %cst_5 = arith.constant 0.000000e+00 : f32
    %7 = vector.broadcast %cst_5 : f32 to vector<8x128xf32>
    %8 = arith.maximumf %6, %7 : vector<8x128xf32>
    %9 = arith.truncf %8 : vector<8x128xf32> to vector<8x128xbf16>
    %c0_6 = arith.constant 0 : index
    %c0_7 = arith.constant 0 : index
    %10 = vector.load %arg4[%c0_6, %c0_7] : memref<128x128xbf16, #tpu.memory_space<vmem>>, vector<128x128xbf16>
    %cst_8 = arith.constant dense<0.000000e+00> : vector<8x128xf32>
    %11 = tpu.matmul %9, %10, %cst_8 {dimension_numbers = #tpu.dot_dimension_numbers<[1], [0], [0], [1], [0, 0, 1, 1], [], []>} : vector<8x128xbf16>, vector<128x128xbf16>, vector<8x128xf32> -> vector<8x128xf32>
    %c0_9 = arith.constant 0 : index
    %c0_10 = arith.constant 0 : index
    %12 = vector.load %arg5[%c0_9, %c0_10] : memref<1x128xf32, #tpu.memory_space<vmem>>, vector<1x128xf32>
    %13 = vector.broadcast %12 : vector<1x128xf32> to vector<8x128xf32>
    %14 = arith.addf %11, %13 : vector<8x128xf32>
    %cst_11 = arith.constant 0.000000e+00 : f32
    %15 = vector.broadcast %cst_11 : f32 to vector<8x128xf32>
    %16 = arith.maximumf %14, %15 : vector<8x128xf32>
    %17 = arith.truncf %16 : vector<8x128xf32> to vector<8x128xbf16>
    %c0_12 = arith.constant 0 : index
    %c0_13 = arith.constant 0 : index
    %18 = vector.load %arg6[%c0_12, %c0_13] : memref<128x4xbf16, #tpu.memory_space<vmem>>, vector<128x4xbf16>
    %cst_14 = arith.constant dense<0.000000e+00> : vector<8x4xf32>
    %19 = tpu.matmul %17, %18, %cst_14 {dimension_numbers = #tpu.dot_dimension_numbers<[1], [0], [0], [1], [0, 0, 1, 1], [], []>} : vector<8x128xbf16>, vector<128x4xbf16>, vector<8x4xf32> -> vector<8x4xf32>
    %c0_15 = arith.constant 0 : index
    %c0_16 = arith.constant 0 : index
    %20 = vector.load %arg7[%c0_15, %c0_16] : memref<1x4xf32, #tpu.memory_space<vmem>>, vector<1x4xf32>
    %21 = vector.broadcast %20 : vector<1x4xf32> to vector<8x4xf32>
    %22 = arith.addf %19, %21 : vector<8x4xf32>
    %c0_17 = arith.constant 0 : index
    %c0_18 = arith.constant 0 : index
    %23 = vector.load %arg8[%c0_17, %c0_18] : memref<8x4xf32, #tpu.memory_space<vmem>>, vector<8x4xf32>
    tpu.vector_store %arg8[%c0_17, %c0_18], %22 {strides = array<i32>} : memref<8x4xf32, #tpu.memory_space<vmem>>, vector<8x4xf32>,
    return
  }
  func.func @transform_0(%arg0: i32) -> (i32, i32) {
    %c0_i32 = arith.constant 0 : i32
    %c0_i32_0 = arith.constant 0 : i32
    return %arg0, %c0_i32 : i32, i32
  }
  func.func @transform_1(%arg0: i32) -> (i32, i32) {
    %c0_i32 = arith.constant 0 : i32
    %c0_i32_0 = arith.constant 0 : i32
    %c0_i32_1 = arith.constant 0 : i32
    return %c0_i32, %c0_i32_0 : i32, i32
  }
  func.func @transform_2(%arg0: i32) -> (i32, i32) {
    %c0_i32 = arith.constant 0 : i32
    %c0_i32_0 = arith.constant 0 : i32
    %c0_i32_1 = arith.constant 0 : i32
    return %c0_i32, %c0_i32_0 : i32, i32
  }
  func.func @transform_3(%arg0: i32) -> (i32, i32) {
    %c0_i32 = arith.constant 0 : i32
    %c0_i32_0 = arith.constant 0 : i32
    %c0_i32_1 = arith.constant 0 : i32
    return %c0_i32, %c0_i32_0 : i32, i32
  }
  func.func @transform_4(%arg0: i32) -> (i32, i32) {
    %c0_i32 = arith.constant 0 : i32
    %c0_i32_0 = arith.constant 0 : i32
    %c0_i32_1 = arith.constant 0 : i32
    return %c0_i32, %c0_i32_0 : i32, i32
  }
  func.func @transform_5(%arg0: i32) -> (i32, i32) {
    %c0_i32 = arith.constant 0 : i32
    %c0_i32_0 = arith.constant 0 : i32
    %c0_i32_1 = arith.constant 0 : i32
    return %c0_i32, %c0_i32_0 : i32, i32
  }
  func.func @transform_6(%arg0: i32) -> (i32, i32) {
    %c0_i32 = arith.constant 0 : i32
    %c0_i32_0 = arith.constant 0 : i32
    %c0_i32_1 = arith.constant 0 : i32
    return %c0_i32, %c0_i32_0 : i32, i32
  }
  func.func @transform_7(%arg0: i32) -> (i32, i32) {
    %c0_i32 = arith.constant 0 : i32
    %c0_i32_0 = arith.constant 0 : i32
    return %arg0, %c0_i32 : i32, i32
  }
}

</mosaic_0001>

<bundles_post_ra>
// kernel: net_forward.1
= control target key start
LH: loop header
LB: loop body
LE: loop exit
PB: predicated region body
PF: predicated region fallthrough
CT: control target
= control target key end

     0   :  { %12 = vsyncpa [#allocation3], 0  ;;  %s508_s0 = inlined_call_operand.hbm [shape: f32[8,5], index: 0, kind: input, shape index: {}]   ;;  %s509_s1 = inlined_call_operand.hbm [shape: bf16[5,128], index: 1, kind: input, shape index: {}]   ;;  %s510_s2 = inlined_call_operand.vmem [shape: f32[1,128], index: 2, kind: input, shape index: {}]   ;;  %s511_s3 = inlined_call_operand.vmem [shape: bf16[128,128], index: 3, kind: input, shape index: {}]   ;;  %s512_s4 = inlined_call_operand.vmem [shape: f32[1,128], index: 4, kind: input, shape index: {}]   ;;  %s513_s5 = inlined_call_operand.vmem [shape: bf16[128,4], index: 5, kind: input, shape index: {}]   ;;  %s514_s6 = inlined_call_operand.vmem [shape: f32[1,4], index: 6, kind: input, shape index: {}]   ;;  %s515_s7 = inlined_call_operand.vmem [shape: f32[8,4], index: 7, kind: output, shape index: {}]  }
   0x1   :  { %s19_s26 = sshll.u32 %s508_s0, 4  ;;  %s20_s26 = int_to_ptr.hbm [resolvable:$true] %s19_s26 }
   0x2   :  { %13 = vsyncpa [#allocation5], 0  ;;  %s399_s27 = smov [#allocation2]   ;;  %s30_s8 = sshll.u32 %s509_s1, 4  ;;  %s31_s8 = int_to_ptr.hbm [resolvable:$true] %s30_s8 }
   0x3   :  { %s21_s28 = sshll.u32 %s399_s27, 4  ;;  %s400_s9 = smov [#allocation4]   ;;  %s22_s28 = int_to_ptr.vmem [resolvable:$true] %s21_s28 }
   0x4   :  { %24 = dma.hbm_to_vmem [thread:$0]  %s20_s26, 128, %s22_s28, [#allocation3]  }
   0x5   :  { %s32_s10 = sshll.u32 %s400_s9, 4  ;;  %s33_s10 = int_to_ptr.vmem [resolvable:$true] %s32_s10 }
   0x6   :  { %35 = dma.hbm_to_vmem [thread:$0]  %s31_s8, 64, %s33_s10, [#allocation5]  }
   0x7   :  { %395 = dma.done.wait [#allocation3], 128  }
   0x8   :  { %396 = vsyncadd [#allocation3], 4294967168 }
   0x9   :  { %397 = dma.done.wait [#allocation5], 64  }
   0xa   :  { %398 = vsyncadd [#allocation5], 4294967232  ;;  %vm66_vm0 = vcmask 1041408   ;;  %vm67_vm1 = vcmask 1042432   ;;  %v401_v0 = vmov 65535   ;;  %v55_v4 = vld [vmem:[#allocation2] sm:$0xff] }
   0xb   :  { %v68_v1 = vsel %vm66_vm0, 4294967295, %v401_v0  ;;  %v57_v3 = vld [vmem:[#allocation4] sm:$0x7]  ;;  %v332_v5 = vld [vmem:[%s511_s3 + $0x38] sm:$0xff]  ;;  %v56_v7 = vpack.c.bf16 %v55_v4, %v55_v4  ;;  %v331_v8 = vld [vmem:[%s511_s3 + $0x30] sm:$0xff]  ;;  %vm62_vm2 = vcmask 39936  }
   0xc   :  { %v69_v2 = vsel %vm67_vm1, %v68_v1, 0  ;;  %156 = vmatpush.bf16.msra.mxu1 %v332_v5  ;;  %v330_v9 = vld [vmem:[%s511_s3 + $0x28] sm:$0xff]  ;;  %v329_v10 = vld [vmem:[%s511_s3 + $0x20] sm:$0xff]  ;;  %v328_v11 = vld [vmem:[%s511_s3 + $0x18] sm:$0xff]  ;;  %vm252_vm3 = vcmask 31744  }
   0xd   :  { %v71_v6 = vand.u32 %v69_v2, %v57_v3  ;;  %v327_v12 = vld [vmem:[%s511_s3 + $0x10] sm:$0xff]  ;;  %v326_v13 = vld [vmem:[%s511_s3 + $0x8] sm:$0xff]  ;;  %v325_v14 = vld [vmem:[%s511_s3] sm:$0xff] }
   0xe   :  { %v340_v15 = vld [vmem:[%s513_s5 + $0x38] sm:$0xff]  ;;  %v339_v16 = vld [vmem:[%s513_s5 + $0x30] sm:$0xff]  ;;  %v338_v17 = vld [vmem:[%s513_s5 + $0x28] sm:$0xff] }
   0xf   :  { %80 = vmatpush.bf16.msra.mxu0 %v71_v6  ;;  %239 = vmatpush.bf16.msra.mxu2 %v340_v15  ;;  %v337_v18 = vld [vmem:[%s513_s5 + $0x20] sm:$0xff]  ;;  %v336_v19 = vld [vmem:[%s513_s5 + $0x18] sm:$0xff]  ;;  %v335_v20 = vld [vmem:[%s513_s5 + $0x10] sm:$0xff] }
  0x10   :  { %157 = vmatpush.bf16.msra.mxu1 %v331_v8  ;;  %v344_v21 = vld [vmem:[%s510_s2] ss:$0 sm:$0xff]  ;;  %v334_v27 = vld [vmem:[%s513_s5 + $0x8] sm:$0xff] }
  0x11   :  { %v333_v28 = vld [vmem:[%s513_s5] sm:$0xff] }
  0x12   :  { %260 = vmatmul.msk.bf16.vlgmr.msra.gmra.mxu0 %vm62_vm2, %v56_v7  ;;  %v345_v29 = vld [vmem:[%s512_s4] ss:$0 sm:$0xff] }
  0x13   :  { %240 = vmatpush.bf16.msra.mxu2 %v339_v16  ;;  %v346_v35 = vld [vmem:[%s514_s6] ss:$0 sm:$0xff] }
  0x14   :  { %158 = vmatpush.bf16.msra.mxu1 %v330_v9 }
  0x17   :  { %241 = vmatpush.bf16.msra.mxu2 %v338_v17 }
  0x18   :  { %159 = vmatpush.bf16.msra.mxu1 %v329_v10 }
  0x1b   :  { %242 = vmatpush.bf16.msra.mxu2 %v337_v18 }
  0x1c   :  { %160 = vmatpush.bf16.msra.mxu1 %v328_v11 }
  0x1f   :  { %243 = vmatpush.bf16.msra.mxu2 %v336_v19 }
  0x20   :  { %161 = vmatpush.bf16.msra.mxu1 %v327_v12 }
  0x23   :  { %244 = vmatpush.bf16.msra.mxu2 %v335_v20 }
  0x24   :  { %162 = vmatpush.bf16.msra.mxu1 %v326_v13 }
  0x27   :  { %245 = vmatpush.bf16.msra.mxu2 %v334_v27 }
  0x28   :  { %163 = vmatpush.bf16.msra.mxu1 %v325_v14 }
  0x2b   :  { %246 = vmatpush.bf16.msra.mxu2 %v333_v28 }
  0x8f   :  { %v82_v22 = vpop.f32.mrf.mxu0 }
  0x90   :  { %v83_v23 = vadd.f32 %v344_v21, %v82_v22 }
  0x92   :  { %v86_v24 = vmax.f32 %v83_v23, 0.0 }
  0x94   :  { %v87_v25 = vpack.c.bf16 %v86_v24, %v86_v24 }
  0x96   :  { %164 = vmatmul.bf16.vlgmr.msra.gmra.mxu1 %v87_v25 }
  0x97   :  { %v84_v26 = vpop.f32.mrf.mxu0 }
 0x113   :  { %v165_v30 = vpop.f32.mrf.mxu1 }
 0x114   :  { %v166_v31 = vadd.f32 %v345_v29, %v165_v30 }
 0x116   :  { %v169_v32 = vmax.f32 %v166_v31, 0.0 }
 0x118   :  { %v170_v33 = vpack.c.bf16 %v169_v32, %v169_v32 }
 0x11a   :  { %247 = vmatmul.bf16.vlgmr.msra.gmra.mxu2 %v170_v33 }
 0x11b   :  { %v167_v34 = vpop.f32.mrf.mxu1 }
 0x19d   :  { %v248_v36 = vpop.f32.mrf.mxu2 }
 0x19e   :  { %v249_v37 = vadd.f32 %v346_v35, %v248_v36 }
 0x1a0   :  { %253 = vst.msk [vmem:[%s515_s7] sm:$0xff] %vm252_vm3, %v249_v37 }
 0x1a5   :  { %v250_v38 = vpop.f32.mrf.mxu2 }
 0x1a6   :  { %258 = vsyncpa [#allocation3], 1 }
 0x1a7   :  { %259 = vsyncpa [#allocation5], 1 }

</bundles_post_ra>
